<compile_context>
chip_gen: v5e
topology: v5e:2x2
jax: 0.10.0
libtpu: 0.0.40
codegen_flags: <defaults>
</compile_context>

<pallas_src>
import jax
import jax.numpy as jnp
from jax.experimental import pallas as pl
from jax.experimental.pallas import tpu as pltpu


def _stacked_lstm_kernel(x_ref, h0_ref, c0_ref, wih0_ref, wihr_ref, whh_ref,
                         b_ref, h1_ref, c1_ref, hcar_ref):
    """One grid step == one LSTM layer (layer index = pl.program_id(0)).

    x_ref    : [B, F]       external input (VMEM-resident; used at layer 0 only)
    h0_ref   : [1, B, H]    this layer's previous hidden state
    c0_ref   : [1, B, H]    this layer's previous cell state
    wih0_ref : [F, 4H]      layer-0 W_ih^T (VMEM-resident, loaded once)
    wihr_ref : [1, H, 4H]   layer-l W_ih^T for l >= 1 (slot 0 unused zeros)
    whh_ref  : [1, H, 4H]   layer-l W_hh^T (streamed per layer)
    b_ref    : [L, 4H]      pre-summed biases (VMEM-resident, f32)
    h1_ref   : [1, B, H]    new hidden state (written straight to [L,B,H] out)
    c1_ref   : [1, B, H]    new cell state
    hcar_ref : [B, H]       VMEM scratch carrying h1 -> next layer's input
    """
    layer = pl.program_id(0)
    n_layers = pl.num_programs(0)
    H = h1_ref.shape[-1]
    wdt = whh_ref.dtype

    # Recurrent-state contribution (f32 MXU accumulation) + pre-summed bias.
    gates_rec = jnp.dot(h0_ref[0].astype(wdt), whh_ref[0],
                        preferred_element_type=jnp.float32)
    gates_rec = gates_rec + b_ref[pl.ds(layer, 1), :].astype(jnp.float32)

    def _finish(gates):
        # Gate math stays f32 (v5e has no bf16 VPU/EUP).
        i_g = jax.nn.sigmoid(gates[:, 0 * H:1 * H])
        f_g = jax.nn.sigmoid(gates[:, 1 * H:2 * H])
        g_g = jnp.tanh(gates[:, 2 * H:3 * H])
        o_g = jax.nn.sigmoid(gates[:, 3 * H:4 * H])
        c1 = f_g * c0_ref[0].astype(jnp.float32) + i_g * g_g
        h1 = o_g * jnp.tanh(c1)
        h1_ref[0] = h1.astype(h1_ref.dtype)
        c1_ref[0] = c1.astype(c1_ref.dtype)

        @pl.when(layer + 1 < n_layers)
        def _():
            # TODO(synk): training-mode dropout would mask/scale h1 here.
            hcar_ref[...] = h1.astype(hcar_ref.dtype)

    # Layer 0 consumes the external input; later layers consume the h-carry.
    # (Only one branch executes per grid step.)
    @pl.when(layer == 0)
    def _():
        _finish(gates_rec
                + jnp.dot(x_ref[...].astype(wdt), wih0_ref[...],
                          preferred_element_type=jnp.float32))

    @pl.when(layer != 0)
    def _():
        _finish(gates_rec
                + jnp.dot(hcar_ref[...], wihr_ref[0],
                          preferred_element_type=jnp.float32))


def prepare_params(params, compute_dtype=None):
    """One-time packing of per-layer LSTMCell params (outside the jit path).

    params : list of (w_ih [4H,Fin], w_hh [4H,H], b_ih [4H], b_hh [4H])
    returns: (w_ih0 [F,4H], w_ihr [L,H,4H], w_hh [L,H,4H], b [L,4H])
             All weights transposed (x @ W^T layout); no zero-padded K rows.
             w_ihr slot 0 is unused (zeros); biases are pre-summed, kept f32.
    """
    H = params[0][1].shape[1]
    dt = compute_dtype if compute_dtype is not None else params[0][0].dtype

    w_ih0 = jnp.transpose(params[0][0]).astype(dt)                   # [F, 4H]
    wihr = [jnp.zeros((H, 4 * H), dt)]                               # slot 0 unused
    for (w_ih, _, _, _) in params[1:]:
        wihr.append(jnp.transpose(w_ih).astype(dt))
    w_ihr = jnp.stack(wihr)                                          # [L, H, 4H]
    w_hh = jnp.stack([jnp.transpose(p[1]).astype(dt) for p in params])   # [L, H, 4H]
    b = jnp.stack([(p[2] + p[3]).astype(jnp.float32) for p in params])   # [L, 4H]
    return w_ih0, w_ihr, w_hh, b


def stacked_lstm_forward(x, h_0, c_0, packed):
    """Forward pass of StackedLSTM (single fused Pallas kernel over layers).

    x      : [B, input_size]
    h_0    : [L, B, H]
    c_0    : [L, B, H]
    packed : output of prepare_params
    returns: (output [B, H], (h_1 [L, B, H], c_1 [L, B, H]))
    """
    w_ih0, w_ihr, w_hh, b = packed
    L, _, four_h = w_hh.shape
    H = four_h // 4
    B, F = x.shape

    # VMEM budget: streamed blocks are double-buffered; resident blocks are not.
    itm_w = w_hh.dtype.itemsize
    itm_x = x.dtype.itemsize
    itm_s = h_0.dtype.itemsize
    per_iter_bytes = (2 * H * four_h * itm_w        # w_ihr + w_hh blocks
                      + 2 * B * H * itm_s           # h_0 + c_0 blocks
                      + 2 * B * H * itm_s)          # h_1 + c_1 blocks
    resident_bytes = (B * F * itm_x                 # x
                      + F * four_h * itm_w          # layer-0 W_ih
                      + L * four_h * 4              # bias table (f32)
                      + B * H * itm_w)              # h-carry scratch
    vmem_needed = 2 * per_iter_bytes + resident_bytes
    vmem_limit = max(32 * 1024 * 1024,
                     min(int(1.5 * vmem_needed) + (4 << 20), 100 * 1024 * 1024))

    cost = pl.CostEstimate(
        flops=int(2 * B * four_h * (F + H + 2 * H * max(L - 1, 0))),
        transcendentals=int(5 * L * B * H),
        bytes_accessed=int(
            w_ih0.size * w_ih0.dtype.itemsize
            + w_ihr.size * w_ihr.dtype.itemsize
            + w_hh.size * w_hh.dtype.itemsize
            + b.size * b.dtype.itemsize
            + x.size * itm_x
            + 2 * h_0.size * itm_s
            + 2 * c_0.size * itm_s),
    )

    grid_spec = pltpu.PrefetchScalarGridSpec(
        num_scalar_prefetch=0,
        grid=(L,),
        in_specs=[
            pl.BlockSpec((B, F), lambda l: (0, 0)),             # x (resident)
            pl.BlockSpec((1, B, H), lambda l: (l, 0, 0)),       # h_0[l]
            pl.BlockSpec((1, B, H), lambda l: (l, 0, 0)),       # c_0[l]
            pl.BlockSpec((F, four_h), lambda l: (0, 0)),        # W_ih layer 0 (resident)
            pl.BlockSpec((1, H, four_h), lambda l: (l, 0, 0)),  # W_ih layers >= 1
            pl.BlockSpec((1, H, four_h), lambda l: (l, 0, 0)),  # W_hh[l]
            pl.BlockSpec((L, four_h), lambda l: (0, 0)),        # bias table (resident)
        ],
        out_specs=(
            pl.BlockSpec((1, B, H), lambda l: (l, 0, 0)),       # h_1[l]
            pl.BlockSpec((1, B, H), lambda l: (l, 0, 0)),       # c_1[l]
        ),
        scratch_shapes=[pltpu.VMEM((B, H), w_hh.dtype)],        # h carry
    )

    h_1, c_1 = pl.pallas_call(
        _stacked_lstm_kernel,
        out_shape=(
            jax.ShapeDtypeStruct((L, B, H), h_0.dtype),
            jax.ShapeDtypeStruct((L, B, H), c_0.dtype),
        ),
        grid_spec=grid_spec,
        compiler_params=pltpu.CompilerParams(
            dimension_semantics=("arbitrary",),   # layers are serially dependent
            vmem_limit_bytes=vmem_limit),
        cost_estimate=cost,
    )(x, h_0, c_0, w_ih0, w_ihr, w_hh, b)

    output = h_1[-1]  # last layer's hidden state (no dropout after last layer)
    return output, (h_1, c_1)


def init_params(key, num_layers, input_size, hidden_size, dtype=jnp.float32):
    """Deterministic init matching nn.LSTMCell shapes:
       W_ih [4H, in], W_hh [4H, H], b_ih [4H], b_hh [4H]."""
    params = []
    stdv = 1.0 / jnp.sqrt(jnp.asarray(hidden_size, dtype))
    in_sz = input_size
    for _ in range(num_layers):
        key, k1, k2, k3, k4 = jax.random.split(key, 5)
        w_ih = jax.random.uniform(k1, (4 * hidden_size, in_sz), dtype,
                                  minval=-stdv, maxval=stdv)
        w_hh = jax.random.uniform(k2, (4 * hidden_size, hidden_size), dtype,
                                  minval=-stdv, maxval=stdv)
        b_ih = jax.random.uniform(k3, (4 * hidden_size,), dtype,
                                  minval=-stdv, maxval=stdv)
        b_hh = jax.random.uniform(k4, (4 * hidden_size,), dtype,
                                  minval=-stdv, maxval=stdv)
        params.append((w_ih, w_hh, b_ih, b_hh))
        in_sz = hidden_size
    return params


if __name__ == "__main__":
    # Small, deterministic example.
    num_layers = 3
    batch = 8
    input_size = 32
    hidden_size = 32

    key = jax.random.PRNGKey(0)
    key, kx, kh, kc = jax.random.split(key, 4)
    x = jax.random.normal(kx, (batch, input_size), jnp.float32)
    h_0 = jax.random.normal(kh, (num_layers, batch, hidden_size), jnp.float32)
    c_0 = jax.random.normal(kc, (num_layers, batch, hidden_size), jnp.float32)

    params = init_params(key, num_layers, input_size, hidden_size)
    packed = prepare_params(params)  # one-time packing (use compute_dtype=bf16 for prod)

    fwd = jax.jit(stacked_lstm_forward)
    out, (h_1, c_1) = fwd(x, h_0, c_0, packed)
    jax.block_until_ready((out, h_1, c_1))

    assert out.shape == (batch, hidden_size)
    assert h_1.shape == (num_layers, batch, hidden_size)
    assert c_1.shape == (num_layers, batch, hidden_size)

    # Pure-JAX reference of the same math (PyTorch LSTMCell semantics).
    def ref_cell(x, h, c, w_ih, w_hh, b_ih, b_hh):
        g = x @ w_ih.T + b_ih + h @ w_hh.T + b_hh
        H = h.shape[-1]
        i = jax.nn.sigmoid(g[:, :H])
        f = jax.nn.sigmoid(g[:, H:2 * H])
        gg = jnp.tanh(g[:, 2 * H:3 * H])
        o = jax.nn.sigmoid(g[:, 3 * H:])
        c1 = f * c + i * gg
        return o * jnp.tanh(c1), c1

    inp = x
    hs, cs = [], []
    for i, p in enumerate(params):
        hi, ci = ref_cell(inp, h_0[i], c_0[i], *p)
        inp = hi
        hs.append(hi)
        cs.append(ci)
    ref_out, ref_h, ref_c = inp, jnp.stack(hs), jnp.stack(cs)

    assert jnp.allclose(out, ref_out, atol=1e-4, rtol=1e-4)
    assert jnp.allclose(h_1, ref_h, atol=1e-4, rtol=1e-4)
    assert jnp.allclose(c_1, ref_c, atol=1e-4, rtol=1e-4)

    print("KERNEL_OK")
</pallas_src>

<mosaic_0001>
module attributes {stable_mosaic.version = 11 : i64} {
  func.func @_stacked_lstm_kernel(%arg0: i32, %arg1: memref<8x32xf32, #tpu.memory_space<vmem>>, %arg2: memref<1x8x32xf32, #tpu.memory_space<vmem>>, %arg3: memref<1x8x32xf32, #tpu.memory_space<vmem>>, %arg4: memref<32x128xf32, #tpu.memory_space<vmem>>, %arg5: memref<1x32x128xf32, #tpu.memory_space<vmem>>, %arg6: memref<1x32x128xf32, #tpu.memory_space<vmem>>, %arg7: memref<3x128xf32, #tpu.memory_space<vmem>>, %arg8: memref<1x8x32xf32, #tpu.memory_space<vmem>>, %arg9: memref<1x8x32xf32, #tpu.memory_space<vmem>>, %arg10: memref<8x32xf32, #tpu.memory_space<vmem>>) attributes {dimension_semantics = [#tpu.dimension_semantics<arbitrary>], iteration_bounds = array<i64: 3>, scalar_prefetch = 0 : i64, scratch_operands = 1 : i64, tpu.core_type = #tpu.core_type<tc>, window_params = [{pipeline_mode = #tpu.pipeline_mode<synchronous>, transform_indices = @transform_0, window_bounds = array<i64: 8, 32>}, {transform_indices = @transform_1, window_bounds = array<i64: 1, 8, 32>}, {transform_indices = @transform_2, window_bounds = array<i64: 1, 8, 32>}, {pipeline_mode = #tpu.pipeline_mode<synchronous>, transform_indices = @transform_3, window_bounds = array<i64: 32, 128>}, {transform_indices = @transform_4, window_bounds = array<i64: 1, 32, 128>}, {transform_indices = @transform_5, window_bounds = array<i64: 1, 32, 128>}, {pipeline_mode = #tpu.pipeline_mode<synchronous>, transform_indices = @transform_6, window_bounds = array<i64: 3, 128>}, {transform_indices = @transform_7, window_bounds = array<i64: 1, 8, 32>}, {transform_indices = @transform_8, window_bounds = array<i64: 1, 8, 32>}]} {
    %c0 = arith.constant 0 : index
    %c0_0 = arith.constant 0 : index
    %c0_1 = arith.constant 0 : index
    %0 = vector.load %arg2[%c0, %c0_0, %c0_1] : memref<1x8x32xf32, #tpu.memory_space<vmem>>, vector<1x8x32xf32>
    %1 = vector.shape_cast %0 : vector<1x8x32xf32> to vector<8x32xf32>
    %c0_2 = arith.constant 0 : index
    %c0_3 = arith.constant 0 : index
    %c0_4 = arith.constant 0 : index
    %2 = vector.load %arg6[%c0_2, %c0_3, %c0_4] : memref<1x32x128xf32, #tpu.memory_space<vmem>>, vector<1x32x128xf32>
    %3 = vector.shape_cast %2 : vector<1x32x128xf32> to vector<32x128xf32>
    %cst = arith.constant dense<0.000000e+00> : vector<8x128xf32>
    %4 = tpu.matmul %1, %3, %cst {dimension_numbers = #tpu.dot_dimension_numbers<[1], [0], [0], [1], [0, 0, 1, 1], [], []>} : vector<8x32xf32>, vector<32x128xf32>, vector<8x128xf32> -> vector<8x128xf32>
    %5 = arith.index_cast %arg0 : i32 to index
    %c0_5 = arith.constant 0 : index
    %6 = vector.load %arg7[%5, %c0_5] : memref<3x128xf32, #tpu.memory_space<vmem>>, vector<1x128xf32>
    %7 = vector.broadcast %6 : vector<1x128xf32> to vector<8x128xf32>
    %8 = arith.addf %4, %7 : vector<8x128xf32>
    %c0_i32 = arith.constant 0 : i32
    %9 = arith.cmpi eq, %arg0, %c0_i32 : i32
    %10 = arith.extui %9 : i1 to i32
    %c0_i32_6 = arith.constant 0 : i32
    %11 = arith.cmpi ne, %10, %c0_i32_6 : i32
    scf.if %11 {
      %c0_9 = arith.constant 0 : index
      %c0_10 = arith.constant 0 : index
      %15 = vector.load %arg1[%c0_9, %c0_10] : memref<8x32xf32, #tpu.memory_space<vmem>>, vector<8x32xf32>
      %c0_11 = arith.constant 0 : index
      %c0_12 = arith.constant 0 : index
      %16 = vector.load %arg4[%c0_11, %c0_12] : memref<32x128xf32, #tpu.memory_space<vmem>>, vector<32x128xf32>
      %cst_13 = arith.constant dense<0.000000e+00> : vector<8x128xf32>
      %17 = tpu.matmul %15, %16, %cst_13 {dimension_numbers = #tpu.dot_dimension_numbers<[1], [0], [0], [1], [0, 0, 1, 1], [], []>} : vector<8x32xf32>, vector<32x128xf32>, vector<8x128xf32> -> vector<8x128xf32>
      %18 = arith.addf %8, %17 : vector<8x128xf32>
      %19 = vector.extract_strided_slice %18 {offsets = [0, 0], sizes = [8, 32], strides = [1, 1]} : vector<8x128xf32> to vector<8x32xf32>
      %20 = arith.negf %19 : vector<8x32xf32>
      %21 = math.exp %20 : vector<8x32xf32>
      %cst_14 = arith.constant 1.000000e+00 : f32
      %22 = vector.broadcast %cst_14 : f32 to vector<8x32xf32>
      %23 = arith.addf %22, %21 : vector<8x32xf32>
      %24 = arith.divf %22, %23 : vector<8x32xf32>
      %25 = vector.extract_strided_slice %18 {offsets = [0, 32], sizes = [8, 32], strides = [1, 1]} : vector<8x128xf32> to vector<8x32xf32>
      %26 = arith.negf %25 : vector<8x32xf32>
      %27 = math.exp %26 : vector<8x32xf32>
      %cst_15 = arith.constant 1.000000e+00 : f32
      %28 = vector.broadcast %cst_15 : f32 to vector<8x32xf32>
      %29 = arith.addf %28, %27 : vector<8x32xf32>
      %30 = arith.divf %28, %29 : vector<8x32xf32>
      %31 = vector.extract_strided_slice %18 {offsets = [0, 64], sizes = [8, 32], strides = [1, 1]} : vector<8x128xf32> to vector<8x32xf32>
      %32 = math.tanh %31 : vector<8x32xf32>
      %33 = vector.extract_strided_slice %18 {offsets = [0, 96], sizes = [8, 32], strides = [1, 1]} : vector<8x128xf32> to vector<8x32xf32>
      %34 = arith.negf %33 : vector<8x32xf32>
      %35 = math.exp %34 : vector<8x32xf32>
      %cst_16 = arith.constant 1.000000e+00 : f32
      %36 = vector.broadcast %cst_16 : f32 to vector<8x32xf32>
      %37 = arith.addf %36, %35 : vector<8x32xf32>
      %38 = arith.divf %36, %37 : vector<8x32xf32>
      %c0_17 = arith.constant 0 : index
      %c0_18 = arith.constant 0 : index
      %c0_19 = arith.constant 0 : index
      %39 = vector.load %arg3[%c0_17, %c0_18, %c0_19] : memref<1x8x32xf32, #tpu.memory_space<vmem>>, vector<1x8x32xf32>
      %40 = vector.shape_cast %39 : vector<1x8x32xf32> to vector<8x32xf32>
      %41 = arith.mulf %30, %40 : vector<8x32xf32>
      %42 = arith.mulf %24, %32 : vector<8x32xf32>
      %43 = arith.addf %41, %42 : vector<8x32xf32>
      %44 = math.tanh %43 : vector<8x32xf32>
      %45 = arith.mulf %38, %44 : vector<8x32xf32>
      %c0_20 = arith.constant 0 : index
      %c0_21 = arith.constant 0 : index
      %c0_22 = arith.constant 0 : index
      %46 = vector.load %arg8[%c0_20, %c0_21, %c0_22] : memref<1x8x32xf32, #tpu.memory_space<vmem>>, vector<1x8x32xf32>
      %47 = vector.shape_cast %46 : vector<1x8x32xf32> to vector<8x32xf32>
      %48 = vector.shape_cast %45 : vector<8x32xf32> to vector<1x8x32xf32>
      tpu.vector_store %arg8[%c0_20, %c0_21, %c0_22], %48 {strides = array<i32>} : memref<1x8x32xf32, #tpu.memory_space<vmem>>, vector<1x8x32xf32>,
      %c0_23 = arith.constant 0 : index
      %c0_24 = arith.constant 0 : index
      %c0_25 = arith.constant 0 : index
      %49 = vector.load %arg9[%c0_23, %c0_24, %c0_25] : memref<1x8x32xf32, #tpu.memory_space<vmem>>, vector<1x8x32xf32>
      %50 = vector.shape_cast %49 : vector<1x8x32xf32> to vector<8x32xf32>
      %51 = vector.shape_cast %43 : vector<8x32xf32> to vector<1x8x32xf32>
      tpu.vector_store %arg9[%c0_23, %c0_24, %c0_25], %51 {strides = array<i32>} : memref<1x8x32xf32, #tpu.memory_space<vmem>>, vector<1x8x32xf32>,
      %c1_i32 = arith.constant 1 : i32
      %52 = arith.addi %arg0, %c1_i32 : i32
      %c3_i32 = arith.constant 3 : i32
      %53 = arith.cmpi slt, %52, %c3_i32 : i32
      %54 = arith.extui %53 : i1 to i32
      %c0_i32_26 = arith.constant 0 : i32
      %55 = arith.cmpi ne, %54, %c0_i32_26 : i32
      scf.if %55 {
        %c0_27 = arith.constant 0 : index
        %c0_28 = arith.constant 0 : index
        %56 = vector.load %arg10[%c0_27, %c0_28] : memref<8x32xf32, #tpu.memory_space<vmem>>, vector<8x32xf32>
        tpu.vector_store %arg10[%c0_27, %c0_28], %45 {strides = array<i32>} : memref<8x32xf32, #tpu.memory_space<vmem>>, vector<8x32xf32>,
      } else {
      }
    } else {
    }
    %c0_i32_7 = arith.constant 0 : i32
    %12 = arith.cmpi ne, %arg0, %c0_i32_7 : i32
    %13 = arith.extui %12 : i1 to i32
    %c0_i32_8 = arith.constant 0 : i32
    %14 = arith.cmpi ne, %13, %c0_i32_8 : i32
    scf.if %14 {
      %c0_9 = arith.constant 0 : index
      %c0_10 = arith.constant 0 : index
      %15 = vector.load %arg10[%c0_9, %c0_10] : memref<8x32xf32, #tpu.memory_space<vmem>>, vector<8x32xf32>
      %c0_11 = arith.constant 0 : index
      %c0_12 = arith.constant 0 : index
      %c0_13 = arith.constant 0 : index
      %16 = vector.load %arg5[%c0_11, %c0_12, %c0_13] : memref<1x32x128xf32, #tpu.memory_space<vmem>>, vector<1x32x128xf32>
      %17 = vector.shape_cast %16 : vector<1x32x128xf32> to vector<32x128xf32>
      %cst_14 = arith.constant dense<0.000000e+00> : vector<8x128xf32>
      %18 = tpu.matmul %15, %17, %cst_14 {dimension_numbers = #tpu.dot_dimension_numbers<[1], [0], [0], [1], [0, 0, 1, 1], [], []>} : vector<8x32xf32>, vector<32x128xf32>, vector<8x128xf32> -> vector<8x128xf32>
      %19 = arith.addf %8, %18 : vector<8x128xf32>
      %20 = vector.extract_strided_slice %19 {offsets = [0, 0], sizes = [8, 32], strides = [1, 1]} : vector<8x128xf32> to vector<8x32xf32>
      %21 = arith.negf %20 : vector<8x32xf32>
      %22 = math.exp %21 : vector<8x32xf32>
      %cst_15 = arith.constant 1.000000e+00 : f32
      %23 = vector.broadcast %cst_15 : f32 to vector<8x32xf32>
      %24 = arith.addf %23, %22 : vector<8x32xf32>
      %25 = arith.divf %23, %24 : vector<8x32xf32>
      %26 = vector.extract_strided_slice %19 {offsets = [0, 32], sizes = [8, 32], strides = [1, 1]} : vector<8x128xf32> to vector<8x32xf32>
      %27 = arith.negf %26 : vector<8x32xf32>
      %28 = math.exp %27 : vector<8x32xf32>
      %cst_16 = arith.constant 1.000000e+00 : f32
      %29 = vector.broadcast %cst_16 : f32 to vector<8x32xf32>
      %30 = arith.addf %29, %28 : vector<8x32xf32>
      %31 = arith.divf %29, %30 : vector<8x32xf32>
      %32 = vector.extract_strided_slice %19 {offsets = [0, 64], sizes = [8, 32], strides = [1, 1]} : vector<8x128xf32> to vector<8x32xf32>
      %33 = math.tanh %32 : vector<8x32xf32>
      %34 = vector.extract_strided_slice %19 {offsets = [0, 96], sizes = [8, 32], strides = [1, 1]} : vector<8x128xf32> to vector<8x32xf32>
      %35 = arith.negf %34 : vector<8x32xf32>
      %36 = math.exp %35 : vector<8x32xf32>
      %cst_17 = arith.constant 1.000000e+00 : f32
      %37 = vector.broadcast %cst_17 : f32 to vector<8x32xf32>
      %38 = arith.addf %37, %36 : vector<8x32xf32>
      %39 = arith.divf %37, %38 : vector<8x32xf32>
      %c0_18 = arith.constant 0 : index
      %c0_19 = arith.constant 0 : index
      %c0_20 = arith.constant 0 : index
      %40 = vector.load %arg3[%c0_18, %c0_19, %c0_20] : memref<1x8x32xf32, #tpu.memory_space<vmem>>, vector<1x8x32xf32>
      %41 = vector.shape_cast %40 : vector<1x8x32xf32> to vector<8x32xf32>
      %42 = arith.mulf %31, %41 : vector<8x32xf32>
      %43 = arith.mulf %25, %33 : vector<8x32xf32>
      %44 = arith.addf %42, %43 : vector<8x32xf32>
      %45 = math.tanh %44 : vector<8x32xf32>
      %46 = arith.mulf %39, %45 : vector<8x32xf32>
      %c0_21 = arith.constant 0 : index
      %c0_22 = arith.constant 0 : index
      %c0_23 = arith.constant 0 : index
      %47 = vector.load %arg8[%c0_21, %c0_22, %c0_23] : memref<1x8x32xf32, #tpu.memory_space<vmem>>, vector<1x8x32xf32>
      %48 = vector.shape_cast %47 : vector<1x8x32xf32> to vector<8x32xf32>
      %49 = vector.shape_cast %46 : vector<8x32xf32> to vector<1x8x32xf32>
      tpu.vector_store %arg8[%c0_21, %c0_22, %c0_23], %49 {strides = array<i32>} : memref<1x8x32xf32, #tpu.memory_space<vmem>>, vector<1x8x32xf32>,
      %c0_24 = arith.constant 0 : index
      %c0_25 = arith.constant 0 : index
      %c0_26 = arith.constant 0 : index
      %50 = vector.load %arg9[%c0_24, %c0_25, %c0_26] : memref<1x8x32xf32, #tpu.memory_space<vmem>>, vector<1x8x32xf32>
      %51 = vector.shape_cast %50 : vector<1x8x32xf32> to vector<8x32xf32>
      %52 = vector.shape_cast %44 : vector<8x32xf32> to vector<1x8x32xf32>
      tpu.vector_store %arg9[%c0_24, %c0_25, %c0_26], %52 {strides = array<i32>} : memref<1x8x32xf32, #tpu.memory_space<vmem>>, vector<1x8x32xf32>,
      %c1_i32 = arith.constant 1 : i32
      %53 = arith.addi %arg0, %c1_i32 : i32
      %c3_i32 = arith.constant 3 : i32
      %54 = arith.cmpi slt, %53, %c3_i32 : i32
      %55 = arith.extui %54 : i1 to i32
      %c0_i32_27 = arith.constant 0 : i32
      %56 = arith.cmpi ne, %55, %c0_i32_27 : i32
      scf.if %56 {
        %c0_28 = arith.constant 0 : index
        %c0_29 = arith.constant 0 : index
        %57 = vector.load %arg10[%c0_28, %c0_29] : memref<8x32xf32, #tpu.memory_space<vmem>>, vector<8x32xf32>
        tpu.vector_store %arg10[%c0_28, %c0_29], %46 {strides = array<i32>} : memref<8x32xf32, #tpu.memory_space<vmem>>, vector<8x32xf32>,
      } else {
      }
    } else {
    }
    return
  }
  func.func @transform_0(%arg0: i32) -> (i32, i32) {
    %c0_i32 = arith.constant 0 : i32
    %c0_i32_0 = arith.constant 0 : i32
    %c0_i32_1 = arith.constant 0 : i32
    return %c0_i32, %c0_i32_0 : i32, i32
  }
  func.func @transform_1(%arg0: i32) -> (i32, i32, i32) {
    %c0_i32 = arith.constant 0 : i32
    %c0_i32_0 = arith.constant 0 : i32
    %c0_i32_1 = arith.constant 0 : i32
    return %arg0, %c0_i32, %c0_i32_0 : i32, i32, i32
  }
  func.func @transform_2(%arg0: i32) -> (i32, i32, i32) {
    %c0_i32 = arith.constant 0 : i32
    %c0_i32_0 = arith.constant 0 : i32
    %c0_i32_1 = arith.constant 0 : i32
    return %arg0, %c0_i32, %c0_i32_0 : i32, i32, i32
  }
  func.func @transform_3(%arg0: i32) -> (i32, i32) {
    %c0_i32 = arith.constant 0 : i32
    %c0_i32_0 = arith.constant 0 : i32
    %c0_i32_1 = arith.constant 0 : i32
    return %c0_i32, %c0_i32_0 : i32, i32
  }
  func.func @transform_4(%arg0: i32) -> (i32, i32, i32) {
    %c0_i32 = arith.constant 0 : i32
    %c0_i32_0 = arith.constant 0 : i32
    %c0_i32_1 = arith.constant 0 : i32
    return %arg0, %c0_i32, %c0_i32_0 : i32, i32, i32
  }
  func.func @transform_5(%arg0: i32) -> (i32, i32, i32) {
    %c0_i32 = arith.constant 0 : i32
    %c0_i32_0 = arith.constant 0 : i32
    %c0_i32_1 = arith.constant 0 : i32
    return %arg0, %c0_i32, %c0_i32_0 : i32, i32, i32
  }
  func.func @transform_6(%arg0: i32) -> (i32, i32) {
    %c0_i32 = arith.constant 0 : i32
    %c0_i32_0 = arith.constant 0 : i32
    %c0_i32_1 = arith.constant 0 : i32
    return %c0_i32, %c0_i32_0 : i32, i32
  }
  func.func @transform_7(%arg0: i32) -> (i32, i32, i32) {
    %c0_i32 = arith.constant 0 : i32
    %c0_i32_0 = arith.constant 0 : i32
    %c0_i32_1 = arith.constant 0 : i32
    return %arg0, %c0_i32, %c0_i32_0 : i32, i32, i32
  }
  func.func @transform_8(%arg0: i32) -> (i32, i32, i32) {
    %c0_i32 = arith.constant 0 : i32
    %c0_i32_0 = arith.constant 0 : i32
    %c0_i32_1 = arith.constant 0 : i32
    return %arg0, %c0_i32, %c0_i32_0 : i32, i32, i32
  }
}

</mosaic_0001>

<bundles_post_ra>
// kernel: stacked_lstm_forward.1
= control target key start
LH: loop header
LB: loop body
LE: loop exit
PB: predicated region body
PF: predicated region fallthrough
CT: control target
= control target key end

     0   :  { %s1672_s0 = inlined_call_operand.hbm [shape: f32[8,32], index: 0, kind: input, shape index: {}]   ;;  %s1673_s1 = inlined_call_operand.hbm [shape: f32[3,8,32], index: 1, kind: input, shape index: {}]   ;;  %s1674_s2 = inlined_call_operand.hbm [shape: f32[3,8,32], index: 2, kind: input, shape index: {}]   ;;  %s1675_s3 = inlined_call_operand.hbm [shape: f32[32,128], index: 3, kind: input, shape index: {}]   ;;  %s1676_s4 = inlined_call_operand.hbm [shape: f32[3,32,128], index: 4, kind: input, shape index: {}]   ;;  %s1677_s5 = inlined_call_operand.hbm [shape: f32[3,32,128], index: 5, kind: input, shape index: {}]   ;;  %s1678_s6 = inlined_call_operand.vmem [shape: f32[3,128], index: 6, kind: input, shape index: {}]   ;;  %s1679_s7 = inlined_call_operand.vmem [shape: f32[3,8,32], index: 7, kind: output, shape index: {0}]   ;;  %s1680_s8 = inlined_call_operand.hbm [shape: f32[3,8,32], index: 8, kind: output, shape index: {1}]  }
   0x1   :  { %1688 = sst [smem:[#allocation25_spill]] %s1672_s0 }
   0x2   :  { %1689 = sst [smem:[#allocation26_spill]] %s1673_s1 }
   0x3   :  { %1690 = sst [smem:[#allocation27_spill]] %s1674_s2 }
   0x4   :  { %1691 = sst [smem:[#allocation28_spill]] %s1675_s3 }
   0x5   :  { %14 = vsyncpa [#allocation4], 0 }
   0x6   :  { %15 = vsyncpa [#allocation7], 0 }
   0x7   :  { %17 = vsyncpa [#allocation7 + $0x1], 0 }
   0x8   :  { %18 = vsyncpa [#allocation10], 0 }
   0x9   :  { %19 = vsyncpa [#allocation5], 0 }
   0xa   :  { %21 = vsyncpa [#allocation5 + $0x1], 0  ;;  %s1359_s27 = smov 0   ;;  %s1361_s28 = smov 0  }
   0xb   :  { %s1363_s29 = smov 0   ;;  %s1365_s30 = smov 0  }
   0xc LB: > { %1692 = sst [smem:[#allocation20_spill]] %s1298_s29  ;;  %s1380_s9 = sadd.s32 1, %s1302_s30   ;;  %s1302_s30 = sphi %s1365_s30, %s1717_s30   ;;  %s1298_s29 = sphi %s1363_s29, %s1719_s29   ;;  %s1294_s28 = sphi %s1361_s28, %s1721_s28   ;;  %s1290_s27 = sphi %s1359_s27, %s1720_s27  }
   0xd   : > { %1693 = sst [smem:[#allocation21_spill]] %s1380_s9  ;;  %s55_s10 = sadd.s32 1, %s1298_s29 }
   0xe   : > { %s52_s11 = ssub.s32 %s1302_s30, %s1380_s9  ;;  %p62_p0 = scmp.ne.s32.totalorder %s1298_s29, %s1294_s28 }
   0xf   : > { %p53_p1 = scmp.eq.s32.totalorder %s52_s11, 0  ;;  %p63_p2 = scmp.eq.s32.totalorder %s1302_s30, 0 }
  0x10   : > { %p977_p4 = scmp.lt.s32.totalorder %s1302_s30, 3  ;;  %s1682_s13 = sand.u32 1, %s1302_s30  }
  0x11   : > { %s1389_s12 = scalar_select %p53_p1, %s1298_s29, %s55_s10  }
  0x12   : > { %p64_p3 = por %p63_p2, %p62_p0  ;;  %s295_s14 = sand.u32 1, %s1298_s29  }
  0x13   : > { %1694 = sst [smem:[#allocation22_spill]] %s1389_s12  ;;  %s1397_s15 = sshll.u32 %s295_s14, 3 }
  0x14   : > { %s900_s16 = sshll.u32 %s1302_s30, 3  ;;  %s1695_s1 = sld [smem:[#allocation26_spill]] }
  0x15   : > { %s297_s21 = scalar_lea.vmem [#allocation6], %s1397_s15  ;;  %p1404_p5 = pnand %p977_p4, %p64_p3 }
  0x16   : > { %s305_s22 = sshll.u32 %s297_s21, 4  ;;  %s1697_s2 = sld [smem:[#allocation27_spill]]  ;;  %s306_s22 = int_to_ptr.vmem [resolvable:$true] %s305_s22 }
  0x17   : > { %s903_s10 = sshll.u32 %s295_s14, 5  ;;  %s1415_s11 = scalar_lea.sflag [#allocation7], %s1682_s13 }
  0x18   : > { %p1044_p7 = pneg %p1404_p5 }
  0x1a   : > { %s301_s19 = scalar_lea.hbm %s1695_s1, %s900_s16  ;;  %s1047_s24 = scalar_lea.hbm %s1695_s1, 24 }
  0x1b   : > { %s303_s20 = sshll.u32 %s301_s19, 4  ;;  %s304_s20 = int_to_ptr.hbm [resolvable:$true] %s303_s20 }
  0x1c   : > { %s1411_s26 = scalar_lea.hbm %s1697_s2, %s900_s16  ;;  %s1040_s17 = sshra.s32 %s304_s20, 4  ;;  %s1041_s17 = int_to_ptr.hbm [resolvable:$true] %s1040_s17 }
  0x1d   : > { %s1042_s18 = scalar_lea.hbm %s1041_s17, 8  ;;  %p1048_p10 = scmp.lt.s32.totalorder %s1041_s17, %s1695_s1 }
  0x1e   : > { %p1043_p6 = scmp.ne.s32.totalorder %s1041_s17, %s1042_s18  ;;  %p1049_p11 = scmp.lt.s32.totalorder %s1047_s24, %s1042_s18 }
  0x20   : > { %p1045_p8 = pnand %p1044_p7, %p1043_p6  ;;  %p1050_p12 = por %p1049_p11, %p1048_p10 }
  0x22   : > { %p1046_p9 = pneg %p1045_p8 }
  0x24   : > { %p1051_p13 = pnand %p1050_p12, %p1046_p9 }
  0x26   : > { %1054 = shalt.err (!%p1051_p13)
}
  0x27   : > { %961 = dma.hbm_to_vmem [thread:$0]  (!%p1404_p5), %s304_s20, 128, %s306_s22, %s1415_s11  }
  0x28   : > { %s335_s14 = scalar_lea.vmem [#allocation11], %s903_s10  ;;  %s357_s17 = scalar_lea.vmem [#allocation12], %s903_s10 }
  0x29   : > { %s1431_s19 = sshll.u32 %s335_s14, 4  ;;  %s1434_s18 = sshll.u32 %s357_s17, 4  ;;  %s366_s18 = int_to_ptr.vmem [resolvable:$true] %s1434_s18 }
  0x2a   : > { %1698 = sst [smem:[#allocation23_spill]] %s1431_s19  ;;  %s1437_s21 = sadd.s32 4294967295, %s1302_s30  }
  0x2b   : > { %s894_s24 = sadd.s32 4294967294, %s1302_s30   ;;  %p68_p1 = scmp.ne.s32.totalorder %s1294_s28, %s1290_s27 }
  0x2c   : > { %p1684_p2 = scmp.eq.s32.totalorder %s1437_s21, 0  ;;  %p238_p3 = scmp.eq.s32.totalorder %s1437_s21, 2 }
  0x2d   : > { %p244_p4 = scmp.eq.s32.totalorder %s894_s24, 2  ;;  %p895_p8 = scmp.ge.s32.totalorder %s1302_s30, 1 }
  0x2e   : > { %p1446_p6 = por %p1684_p2, %p68_p1  ;;  %p1454_p9 = por %p238_p3, %p62_p0 }
  0x2f   : > { %p1458_p10 = por %p244_p4, %p68_p1  ;;  %p251_p11 = scmp.lt.s32.totalorder %s1302_s30, 4 }
  0x30   : > { %s1703_s0 = sld [smem:[#allocation25_spill]]  ;;  %s1304_s24 = smov [#allocation3]  }
  0x31   : > { %s1701_s10 = scalar_select %p1458_p10, 1, 0 }
  0x32   : > { %p1467_p13 = pnand %p895_p8, %p251_p11  ;;  %s265_s19 = sshll.u32 %s1304_s24, 4  ;;  %s266_s19 = int_to_ptr.vmem [resolvable:$true] %s265_s19 }
  0x33   : > { %1702 = sst [smem:[#allocation24_spill]] %s1701_s10  ;;  %s322_s13 = sshll.u32 %s1411_s26, 4  ;;  %s323_s13 = int_to_ptr.hbm [resolvable:$true] %s322_s13 }
  0x34   : > { %p951_p0 = pneg %p1467_p13  ;;  %s316_s1 = scalar_lea.vmem [#allocation8], %s1397_s15 }
  0x35   : > { %s324_s12 = sshll.u32 %s316_s1, 4  ;;  %s1070_s25 = sshra.s32 %s323_s13, 4  ;;  %s325_s12 = int_to_ptr.vmem [resolvable:$true] %s324_s12  ;;  %s1071_s25 = int_to_ptr.hbm [resolvable:$true] %s1070_s25 }
  0x36   : > { %s263_s14 = sshll.u32 %s1703_s0, 4  ;;  %p1477_p1 = pnand %p951_p0, %p1684_p2  ;;  %s264_s14 = int_to_ptr.hbm [resolvable:$true] %s263_s14 }
  0x37   : > { %s1072_s0 = scalar_lea.hbm %s1071_s25, 8  ;;  %s1077_s29 = scalar_lea.hbm %s1697_s2, 24 }
  0x38   : > { %p1073_p3 = scmp.ne.s32.totalorder %s1071_s25, %s1072_s0  ;;  %p1078_p11 = scmp.lt.s32.totalorder %s1071_s25, %s1697_s2 }
  0x39   : > { %p1079_p0 = scmp.lt.s32.totalorder %s1077_s29, %s1072_s0 }
  0x3a   : > { %p1075_p4 = pnand %p1073_p3, %p1044_p7 }
  0x3b   : > { %p1080_p12 = por %p1079_p0, %p1078_p11 }
  0x3c   : > { %p1076_p8 = pneg %p1075_p4 }
  0x3e   : > { %p1081_p2 = pnand %p1080_p12, %p1076_p8 }
  0x40   : > { %1084 = shalt.err (!%p1081_p2)
}
  0x41   : > { %964 = dma.hbm_to_vmem [thread:$0]  (!%p1404_p5), %s323_s13, 128, %s325_s12, %s1415_s11  }
  0x42   : > { %s1706_s3 = sld [smem:[#allocation28_spill]]  ;;  %s1305_s0 = smov [#allocation9]  }
  0x43   : > { %954 = dma.hbm_to_vmem [thread:$0]  (!%p1477_p1), %s264_s14, 128, %s266_s19, [#allocation4]  }
  0x44   : > { %s276_s29 = sshll.u32 %s1305_s0, 4  ;;  %s1306_s25 = smov 128   ;;  %s277_s29 = int_to_ptr.vmem [resolvable:$true] %s276_s29 }
  0x45   : > { %s1307_s24 = smov 8   ;;  %s931_s12 = sshll.u32 %s1302_s30, 5 }
  0x46   : > { %s340_s10 = scalar_lea.hbm %s1676_s4, %s931_s12  ;;  %s362_s15 = scalar_lea.hbm %s1677_s5, %s931_s12 }
  0x47   : > { %s341_s1 = sshll.u32 %s340_s10, 4  ;;  %s363_s0 = sshll.u32 %s362_s15, 4  ;;  %s342_s1 = int_to_ptr.hbm [resolvable:$true] %s341_s1  ;;  %s1511_s0 = int_to_ptr.hbm [resolvable:$true] %s363_s0 }
  0x48   : > { %s274_s26 = sshll.u32 %s1706_s3, 4  ;;  %s1707_s16 = sand.u32 1, %s1302_s30   ;;  %s275_s26 = int_to_ptr.hbm [resolvable:$true] %s274_s26 }
  0x49   : > { %957 = dma.hbm_to_vmem [thread:$0]  (!%p1477_p1), %s275_s26, 512, %s277_s29, [#allocation10], %s1306_s25, %s1306_s25, %s1307_s24  }
  0x4a   : > { %s332_s2 = scalar_lea.sflag [#allocation4], %s1707_s16  ;;  %s1160_s3 = sshra.s32 %s342_s1, 4  ;;  %s1161_s3 = int_to_ptr.hbm [resolvable:$true] %s1160_s3 }
  0x4b   : > { %s1162_s26 = scalar_lea.hbm %s1161_s3, 32  ;;  %s1167_s9 = scalar_lea.hbm %s1676_s4, 96 }
  0x4c   : > { %p1163_p2 = scmp.ne.s32.totalorder %s1161_s3, %s1162_s26  ;;  %p1168_p3 = scmp.lt.s32.totalorder %s1161_s3, %s1676_s4 }
  0x4d   : > { %p1169_p4 = scmp.lt.s32.totalorder %s1167_s9, %s1162_s26 }
  0x4e   : > { %p1165_p12 = pnand %p1163_p2, %p1044_p7 }
  0x4f   : > { %p1170_p8 = por %p1169_p4, %p1168_p3 }
  0x50   : > { %p1166_p1 = pneg %p1165_p12 }
  0x52   : > { %p1171_p11 = pnand %p1170_p8, %p1166_p1 }
  0x54   : > { %1174 = shalt.err (!%p1171_p11)
}
  0x55   : > { %s1708_s19 = sld [smem:[#allocation23_spill]]  ;;  %s1190_s15 = sshra.s32 %s1511_s0, 4  ;;  %s1191_s15 = int_to_ptr.hbm [resolvable:$true] %s1190_s15 }
  0x56   : > { %s1192_s16 = scalar_lea.hbm %s1191_s15, 32  ;;  %s1197_s29 = scalar_lea.hbm %s1677_s5, 96 }
  0x57   : > { %p1193_p0 = scmp.ne.s32.totalorder %s1191_s15, %s1192_s16  ;;  %p1198_p1 = scmp.lt.s32.totalorder %s1191_s15, %s1677_s5 }
  0x58   : > { %p1199_p3 = scmp.lt.s32.totalorder %s1197_s29, %s1192_s16 }
  0x59   : > { %p1195_p2 = pnand %p1193_p0, %p1044_p7 }
  0x5a   : > { %p1200_p4 = por %p1199_p3, %p1198_p1 }
  0x5b   : > { %s1709_s14 = int_to_ptr.vmem [resolvable:$true] %s1708_s19  ;;  %p1196_p12 = pneg %p1195_p2 }
  0x5c   : > { %967 = dma.hbm_to_vmem [thread:$0]  (!%p1404_p5), %s342_s1, 512, %s1709_s14, %s332_s2, %s1306_s25, %s1306_s25, %s1307_s24  }
  0x5d   : > { %p1201_p8 = pnand %p1200_p4, %p1196_p12 }
  0x5f   : > { %1204 = shalt.err (!%p1201_p8)
}
  0x60   : > { %970 = dma.hbm_to_vmem [thread:$0]  (!%p1404_p5), %s1511_s0, 512, %s366_s18, %s1415_s11, %s1306_s25, %s1306_s25, %s1307_s24  }
  0x61   : > { %377 = sbr.rel (%p1467_p13) target bundleno = 1476 (0x5c4), region = 48  ;;  %p1710_p7 = scmp.eq.s32.totalorder (!%p1467_p13), %s1437_s21, 0 }
  0x66   : > { %1265 = dma.done.wait (%p1710_p7), [#allocation4], 128   ;;  %p1711_p11 = pmov %p1710_p7 }
  0x67   : > { %s384_s2 = sand.u32 1, %s1437_s21   ;;  %s1558_s23 = sand.u32 1, %s1294_s28  }
  0x68   : > { %1267 = vsyncadd (%p1711_p11), [#allocation4], 4294967168  ;;  %s1561_s1 = sshll.u32 %s1558_s23, 3  ;;  %s385_s11 = scalar_lea.sflag [#allocation7], %s384_s2 }
  0x69   : > { %s388_s18 = scalar_lea.vmem [#allocation6], %s1561_s1 }
  0x6a   : > { %1269 = dma.done.wait (%p1446_p6), %s385_s11, 256  }
  0x6b   : > { %1271 = vsyncadd (%p1446_p6), %s385_s11, 4294967040  ;;  %s398_s17 = scalar_lea.vmem [#allocation8], %s1561_s1  ;;  %p1712_p5 = pmov %p1710_p7 }
  0x6d   : > { %1273 = dma.done.wait (%p1712_p5), [#allocation10], 512   ;;  %p1713_p13 = pmov %p1712_p5 }
  0x6e   : > { %s914_s25 = sshll.u32 %s1558_s23, 5  ;;  %s410_s24 = scalar_lea.sflag [#allocation4], %s384_s2 }
  0x6f   : > { %1275 = vsyncadd (%p1713_p13), [#allocation10], 4294966784  ;;  %s1574_s0 = scalar_lea.vmem [#allocation11], %s914_s25 }
  0x70   : > { %1277 = dma.done.wait (%p1446_p6), %s410_s24, 512  }
  0x71   : > { %1279 = vsyncadd (%p1446_p6), %s410_s24, 4294966784  ;;  %s423_s12 = scalar_lea.vmem [#allocation12], %s914_s25 }
  0x72   : > { %1281 = dma.done.wait (%p1446_p6), %s385_s11, 512  }
  0x73   : > { %1283 = vsyncadd (%p1446_p6), %s385_s11, 4294966784  ;;  %p476_p0 = scmp.lt.s32.totalorder %s1437_s21, 2  ;;  %v484_v0 = vld [vmem:[%s423_s12 + $0x18] sm:$0xff]  ;;  %v483_v1 = vld [vmem:[%s423_s12 + $0x10] sm:$0xff]  ;;  %s485_s29 = scalar_lea.vmem %s1678_s6, %s1437_s21  ;;  %vm488_vm0 = vcmask 261120  }
  0x74   : > { %504 = vmatpush.msra.mxu0 %v484_v0  ;;  %v482_v2 = vld [vmem:[%s423_s12 + $0x8] sm:$0xff]  ;;  %v481_v3 = vld [vmem:[%s423_s12] sm:$0xff]  ;;  %v1023_v5 = vld [vmem:[%s485_s29] ss:$0 sm:$0xff]  ;;  %s1599_s20 = scalar_lea.vmem [#allocation13], %s1561_s1  ;;  %p1714_p6 = scmp.ne.s32.totalorder %s1437_s21, 0 }
  0x75   : > { %s477_s10 = scalar_select %p476_p0, %s1437_s21, 2  ;;  %v480_v4 = vld [vmem:[%s388_s18] sm:$0xff] }
  0x76   : > { %505 = vmatpush.msra.mxu0 %v483_v1  ;;  %s1308_s13 = smov (!%p1714_p6), 64   ;;  %s1309_s9 = smov (!%p1714_p6), 32  }
  0x77   : > { %s917_s19 = sshll.u32 %s477_s10, 3  ;;  %s597_s2 = sadd.s32 (!%p1714_p6), 1, %s1437_s21 }
  0x78   : > { %s1589_s16 = scalar_lea.vmem %s1679_s7, %s917_s19  ;;  %506 = vmatpush.msra.mxu0 %v482_v2  ;;  %s1310_s11 = smov (!%p1714_p6), 96  }
  0x79   : > { %p922_p2 = scmp.ge.s32.totalorder (!%p1714_p6), %s597_s2, 3 }
  0x7a   : > { %507 = vmatpush.msra.mxu0 %v481_v3 }
  0x7b   : > { %918 = vmatmul.msk.f32.vlgmr.msra.gmra.mxu0 %vm488_vm0, %v480_v4 }
  0xf5   : > { %515 = sbr.rel (%p1714_p6) target bundleno = 852 (0x354), region = 76 }
  0xf8   : > { %v509_v6 = vpop.f32.mrf.mxu0 }
  0xf9   : > { %v1596_v7 = vadd.f32 %v1023_v5, %v509_v6 }
  0xfa   : > { %v520_v8 = vld [vmem:[#allocation9 + $0x18] sm:$0xff]  ;;  %v519_v9 = vld [vmem:[#allocation9 + $0x10] sm:$0xff]  ;;  %v518_v10 = vld [vmem:[#allocation9 + $0x8] sm:$0xff] }
  0xfb   : > { %536 = vmatpush.msra.mxu0 %v520_v8  ;;  %v517_v11 = vld [vmem:[#allocation9] sm:$0xff]  ;;  %v516_v12 = vld [vmem:[#allocation3] sm:$0xff] }
  0xfc   : > { %v565_v16 = vld [vmem:[%s398_s17] sm:$0xff] }
  0xfd   : > { %537 = vmatpush.msra.mxu0 %v519_v9 }
  0xff   : > { %538 = vmatpush.msra.mxu0 %v518_v10 }
 0x101   : > { %539 = vmatpush.msra.mxu0 %v517_v11 }
 0x102   : > { %920 = vmatmul.msk.f32.vlgmr.msra.gmra.mxu0 %vm488_vm0, %v516_v12 }
 0x17f   : > { %v541_v13 = vpop.f32.mrf.mxu0 }
 0x180   : > { %v544_v14 = vadd.f32 %v541_v13, %v1596_v7 }
 0x182   : > { %1024 = vtanh.f32 %v544_v14  ;;  %v921_v17 = vmul.f32 -1.442695, %v544_v14 }
 0x184   : > { %1026 = vpow2.f32 %v921_v17 }
 0x188   : > { %v1025_v15 = vpop.eup %1024 }
 0x189   : > { %572 = vrot.lane.b32.xlu0 %v1025_v15, %s1308_s13 }
 0x18a   : > { %v1027_v18 = vpop.eup %1026 }
 0x18b   : > { %v548_v19 = vadd.f32 1.0, %v1027_v18 }
 0x18d   : > { %1028 = vrcp.f32 %v548_v19  ;;  %v560_v25 = vand.u32 2147483648, %v548_v19  ;;  %vm554_vm2 = vweird.f32 %v548_v19  ;;  %v558_v26 = vand.u32 2147483647, %v548_v19 }
 0x18f   : > { %v561_v28 = vor.u32 1.1754944e-38, %v560_v25  ;;  %vm559_vm4 = vcmp.eq.f32.partialorder %v558_v26, 8.507059e+37 }
 0x191   : > { %567 = vrot.lane.b32.xlu0 %v565_v16, %s1309_s9 }
 0x193   : > { %v1029_v20 = vpop.eup %1028 }
 0x194   : > { %v550_v21 = vmul.f32 %v1029_v20, %v548_v19  ;;  %vm555_vm1 = vweird.f32 %v1029_v20 }
 0x195   : > { %vm556_vm3 = vmor %vm554_vm2, %vm555_vm1 }
 0x196   : > { %v551_v22 = vsub.f32 1.0, %v550_v21 }
 0x198   : > { %v552_v23 = vmul.f32 %v1029_v20, %v551_v22 }
 0x19a   : > { %v553_v24 = vadd.f32 %v1029_v20, %v552_v23 }
 0x19c   : > { %v557_v27 = vsel %vm556_vm3, %v1029_v20, %v553_v24 }
 0x19d   : > { %v562_v30 = vsel %vm559_vm4, %v561_v28, %v557_v27 }
 0x1fb   : > { %v573_v29 = vpop.permute.xlu0 %572 }
 0x1fc   : > { %v575_v31 = vmul.f32 %v573_v29, %v562_v30 }
 0x1fe   : > { %577 = vrot.lane.b32.xlu1 %v575_v31, %s1309_s9 }
 0x203   : > { %v568_v32 = vpop.permute.xlu0 %567 }
 0x204   : > { %v570_v33 = vmul.f32 %v568_v32, %v562_v30 }
 0x270   : > { %v578_v34 = vpop.permute.xlu1 %577 }
 0x271   : > { %v580_v35 = vadd.f32 %v578_v34, %v570_v33 }
 0x273   : > { %1030 = vtanh.f32 %v580_v35 }
 0x279   : > { %v1031_v36 = vpop.eup %1030 }
 0x27a   : > { %583 = vrot.lane.b32.xlu1 %v1031_v36, %s1308_s13 }
 0x2ec   : > { %v584_v37 = vpop.permute.xlu1 %583 }
 0x2ed   : > { %v586_v38 = vmul.f32 %v584_v37, %v562_v30 }
 0x2ef   : > { %588 = vrot.lane.b32.xlu2 %v586_v38, %s1309_s9 }
 0x2f7   : > { %593 = vrot.lane.b32.xlu2 %v580_v35, %s1310_s11 }
 0x349   : > { %v589_v39 = vpop.permute.xlu2 %588 }
 0x34a   : > { %591 = vst.msk [vmem:[%s1589_s16] sm:$0xff] %vm488_vm0, %v589_v39 }
 0x34e   : > { %601 = sbr.rel (%p922_p2) target bundleno = 852 (0x354), region = 80 }
 0x351   : > { %v594_v40 = vpop.permute.xlu2 %593 }
 0x352   : > { %596 = vst.msk [vmem:[%s1599_s20] sm:$0xff] %vm488_vm0, %v594_v40 }
 0x353   : > { %602 = vst.msk [vmem:[#allocation2] sm:$0xff] %vm488_vm0, %v589_v39 }
 0x354 PF: > { %p1715_p12 = scmp.eq.s32.totalorder %s1437_s21, 0 }
 0x355   : > { %s1311_s18 = smov (!%p1715_p12), 64   ;;  %s1312_s25 = smov (!%p1715_p12), 32  }
 0x356   : > { %606 = sbr.rel (%p1715_p12) target bundleno = 1461 (0x5b5), region = 84  ;;  %s688_s1 = sadd.s32 (!%p1715_p12), 1, %s1437_s21 }
 0x357   : > { %p926_p1 = scmp.ge.s32.totalorder (!%p1715_p12), %s688_s1, 3 }
 0x35b   : > { %v611_v41 = vld [vmem:[%s1574_s0 + $0x18] sm:$0xff]  ;;  %v610_v42 = vld [vmem:[%s1574_s0 + $0x10] sm:$0xff]  ;;  %v609_v43 = vld [vmem:[%s1574_s0 + $0x8] sm:$0xff] }
 0x35c   : > { %627 = vmatpush.msra.mxu0 %v611_v41  ;;  %v608_v44 = vld [vmem:[%s1574_s0] sm:$0xff]  ;;  %v607_v45 = vld [vmem:[#allocation2] sm:$0xff] }
 0x35d   : > { %v656_v49 = vld [vmem:[%s398_s17] sm:$0xff]  ;;  %s1313_s17 = smov 96  }
 0x35e   : > { %628 = vmatpush.msra.mxu0 %v610_v42 }
 0x360   : > { %629 = vmatpush.msra.mxu0 %v609_v43 }
 0x362   : > { %630 = vmatpush.msra.mxu0 %v608_v44 }
 0x363   : > { %924 = vmatmul.msk.f32.vlgmr.msra.gmra.mxu0 %vm488_vm0, %v607_v45 }
 0x3e0   : > { %v632_v46 = vpop.f32.mrf.mxu0 }
 0x3e1   : > { %v635_v47 = vadd.f32 %v632_v46, %v1596_v7 }
 0x3e3   : > { %1032 = vtanh.f32 %v635_v47  ;;  %v925_v50 = vmul.f32 -1.442695, %v635_v47 }
 0x3e5   : > { %1034 = vpow2.f32 %v925_v50 }
 0x3e9   : > { %v1033_v48 = vpop.eup %1032 }
 0x3ea   : > { %663 = vrot.lane.b32.xlu0 %v1033_v48, %s1311_s18 }
 0x3eb   : > { %v1035_v51 = vpop.eup %1034 }
 0x3ec   : > { %v639_v52 = vadd.f32 1.0, %v1035_v51 }
 0x3ee   : > { %1036 = vrcp.f32 %v639_v52  ;;  %v651_v58 = vand.u32 2147483648, %v639_v52  ;;  %vm645_vm6 = vweird.f32 %v639_v52  ;;  %v649_v59 = vand.u32 2147483647, %v639_v52 }
 0x3f0   : > { %v652_v61 = vor.u32 1.1754944e-38, %v651_v58  ;;  %vm650_vm8 = vcmp.eq.f32.partialorder %v649_v59, 8.507059e+37 }
 0x3f2   : > { %658 = vrot.lane.b32.xlu0 %v656_v49, %s1312_s25 }
 0x3f4   : > { %v1037_v53 = vpop.eup %1036 }
 0x3f5   : > { %v641_v54 = vmul.f32 %v1037_v53, %v639_v52  ;;  %vm646_vm5 = vweird.f32 %v1037_v53 }
 0x3f6   : > { %vm647_vm7 = vmor %vm645_vm6, %vm646_vm5 }
 0x3f7   : > { %v642_v55 = vsub.f32 1.0, %v641_v54 }
 0x3f9   : > { %v643_v56 = vmul.f32 %v1037_v53, %v642_v55 }
 0x3fb   : > { %v644_v57 = vadd.f32 %v1037_v53, %v643_v56 }
 0x3fd   : > { %v648_v60 = vsel %vm647_vm7, %v1037_v53, %v644_v57 }
 0x3fe   : > { %v653_v63 = vsel %vm650_vm8, %v652_v61, %v648_v60 }
 0x45c   : > { %v664_v62 = vpop.permute.xlu0 %663 }
 0x45d   : > { %v666_v0 = vmul.f32 %v664_v62, %v653_v63 }
 0x45f   : > { %668 = vrot.lane.b32.xlu1 %v666_v0, %s1312_s25 }
 0x464   : > { %v659_v1 = vpop.permute.xlu0 %658 }
 0x465   : > { %v661_v2 = vmul.f32 %v659_v1, %v653_v63 }
 0x4d1   : > { %v669_v3 = vpop.permute.xlu1 %668 }
 0x4d2   : > { %v671_v4 = vadd.f32 %v669_v3, %v661_v2 }
 0x4d4   : > { %1038 = vtanh.f32 %v671_v4 }
 0x4da   : > { %v1039_v5 = vpop.eup %1038 }
 0x4db   : > { %674 = vrot.lane.b32.xlu1 %v1039_v5, %s1311_s18 }
 0x54d   : > { %v675_v6 = vpop.permute.xlu1 %674 }
 0x54e   : > { %v677_v7 = vmul.f32 %v675_v6, %v653_v63 }
 0x550   : > { %679 = vrot.lane.b32.xlu2 %v677_v7, %s1312_s25 }
 0x558   : > { %684 = vrot.lane.b32.xlu2 %v671_v4, %s1313_s17 }
 0x5aa   : > { %v680_v8 = vpop.permute.xlu2 %679 }
 0x5ab   : > { %682 = vst.msk [vmem:[%s1589_s16] sm:$0xff] %vm488_vm0, %v680_v8 }
 0x5af   : > { %692 = sbr.rel (%p926_p1) target bundleno = 1461 (0x5b5), region = 88 }
 0x5b2   : > { %v685_v9 = vpop.permute.xlu2 %684 }
 0x5b3   : > { %687 = vst.msk [vmem:[%s1599_s20] sm:$0xff] %vm488_vm0, %v685_v9 }
 0x5b4   : > { %693 = vst.msk [vmem:[#allocation2] sm:$0xff] %vm488_vm0, %v680_v8 }
 0x5b5 PF: > { %s928_s24 = sshll.u32 %s1437_s21, 3  ;;  %s714_s19 = sshll.u32 %s1599_s20, 4  ;;  %s715_s19 = int_to_ptr.vmem [resolvable:$true] %s714_s19 }
 0x5b6   : > { %s712_s10 = scalar_lea.hbm %s1680_s8, %s928_s24  ;;  %s699_s15 = scalar_lea.sflag [#allocation5], %s1558_s23 }
 0x5b7   : > { %s716_s14 = sshll.u32 %s712_s10, 4  ;;  %s1240_s21 = scalar_lea.hbm %s1680_s8, 24  ;;  %s717_s14 = int_to_ptr.hbm [resolvable:$true] %s716_s14 }
 0x5b8   : > { %s1234_s16 = sshra.s32 %s717_s14, 4  ;;  %s1235_s16 = int_to_ptr.hbm [resolvable:$true] %s1234_s16 }
 0x5b9   : > { %s1236_s3 = scalar_lea.hbm %s1235_s16, 8  ;;  %p1241_p7 = scmp.lt.s32.totalorder %s1235_s16, %s1680_s8 }
 0x5ba   : > { %p1237_p3 = scmp.ne.s32.totalorder %s1235_s16, %s1236_s3  ;;  %p1242_p11 = scmp.lt.s32.totalorder %s1240_s21, %s1236_s3 }
 0x5bc   : > { %p1238_p4 = pnand %p1237_p3, %p1454_p9  ;;  %p1243_p5 = por %p1242_p11, %p1241_p7 }
 0x5be   : > { %p1239_p8 = pneg %p1238_p4 }
 0x5c0   : > { %p1244_p13 = pnand %p1243_p5, %p1239_p8 }
 0x5c2   : > { %1247 = shalt.err (!%p1244_p13)
}
 0x5c3   : > { %949 = dma.vmem_to_hbm [thread:$0]  (%p1454_p9), %s715_s19, 128, %s717_s14, %s699_s15  }
 0x5c4 PF: > { %p980_p0 = scmp.ge.s32.totalorder %s1302_s30, 2  ;;  %s735_s20 = sand.u32 1, %s1290_s27  }
 0x5c5   : > { %s736_s2 = scalar_lea.sflag [#allocation5], %s735_s20 }
 0x5c6   : > { %p972_p6 = pnand %p980_p0, %p1458_p10 }
 0x5c8   : > { %p973_p2 = pneg %p972_p6 }
 0x5ca   : > { %1285 = dma.done.wait (%p973_p2), %s736_s2, 128  }
 0x5cb   : > { %1287 = vsyncadd (%p973_p2), %s736_s2, 4294967168  ;;  %s1717_s30 = sld [smem:[#allocation21_spill]]  ;;  %s1720_s27 = smov %s1294_s28 }
 0x5cc   : > { %s1718_s11 = sld [smem:[#allocation20_spill]] }
 0x5cd   : > { %s1719_s29 = sld [smem:[#allocation22_spill]] }
 0x5d1   : > { %p24_p12 = scmp.ge.s32.totalorder %s1717_s30, 5  }
 0x5d2   : > { %s1721_s28 = smov %s1718_s11 }
 0x5d3   :  { %26 = sbr.rel (!%p24_p12) target bundleno = 12 (0xc), region = 164 }
 0x5d8   :  { %742 = vsyncpa [#allocation4], 1 }
 0x5d9   :  { %744 = vsyncpa [#allocation4 + $0x1], 1 }
 0x5da   :  { %745 = vsyncpa [#allocation7], 1 }
 0x5db   :  { %747 = vsyncpa [#allocation7 + $0x1], 1 }
 0x5dc   :  { %748 = vsyncpa [#allocation10], 1 }
 0x5dd   :  { %749 = vsyncpa [#allocation5], 1 }
 0x5de   :  { %751 = vsyncpa [#allocation5 + $0x1], 1 }

</bundles_post_ra>
